<compile_context>
chip_gen: v7x
topology: tpu7x:2x2x1
jax: 0.10.0
libtpu: 0.0.40
codegen_flags: <defaults>
</compile_context>

<pallas_src>
import functools

import jax
import jax.numpy as jnp
from jax import lax
from jax.experimental import pallas as pl
from jax.experimental.pallas import tpu as pltpu


def _round_up(x: int, m: int) -> int:
    return (x + m - 1) // m * m


def _cdiv(a: int, b: int) -> int:
    return (a + b - 1) // b


@functools.lru_cache(maxsize=1)
def _tpu_vmem_bytes() -> int:
    """Physical per-core VMEM; falls back to 128 MiB (v5e/v6e) if unknown."""
    try:
        info = pltpu.get_tpu_info()
        for name in ("vmem_capacity_bytes", "vmem_bytes", "vmem_capacity"):
            v = getattr(info, name, None)
            if v is not None:
                v = int(v)
                if v > 0:
                    return v
    except Exception:
        pass
    return 128 * 1024 * 1024


@functools.lru_cache(maxsize=1)
def _buffered_one_supported() -> bool:
    """Probe whether BlockSpec(pipeline_mode=pl.Buffered(1)) compiles & runs."""
    if not hasattr(pl, "Buffered"):
        return False
    try:
        resident = pl.BlockSpec((8, 128), lambda i: (0, 0),
                                pipeline_mode=pl.Buffered(1))

        def k(a_ref, o_ref):
            o_ref[...] = a_ref[...] * 2.0

        x = jnp.ones((8, 128), jnp.float32)
        out = pl.pallas_call(
            k,
            out_shape=jax.ShapeDtypeStruct((16, 128), jnp.float32),
            grid=(2,),
            in_specs=[resident],
            out_specs=pl.BlockSpec((8, 128), lambda i: (i, 0)),
        )(x)
        jax.block_until_ready(out)
        return bool(jnp.allclose(out, 2.0))
    except Exception:
        return False


def _make_kernel(num_linear, relu_last, softmax, normalize, sigmoid, compute_dtype):
    """One fused chunk: matmuls + bias (+ReLU), optional head ops on the tail."""

    def kernel(*refs):
        # refs = (x, w0..w{L-1}, b0..b{L-1}, out)
        x_ref = refs[0]
        w_refs = refs[1:1 + num_linear]
        b_refs = refs[1 + num_linear:1 + 2 * num_linear]
        out_ref = refs[1 + 2 * num_linear]

        h = x_ref[...]                                          # (TM, in_pad) bf16
        for i in range(num_linear):
            acc = jnp.dot(h, w_refs[i][...],
                          preferred_element_type=jnp.float32)   # MXU, f32 acc
            acc = acc + b_refs[i][...]                          # f32 bias
            last = i == num_linear - 1
            if (not last) or relu_last:
                acc = jnp.maximum(acc, 0.0)                     # ReLU
            h = acc if last else acc.astype(compute_dtype)      # bf16 for next matmul

        if softmax:
            # Padded logit lanes were biased to -1e30 in the wrapper, so exp()
            # underflows to exactly 0 there: no in-kernel masking needed.
            m = jnp.max(h, axis=-1, keepdims=True)
            e = jnp.exp(h - m)
            denom = jnp.sum(e, axis=-1, keepdims=True)
            h = e * pl.reciprocal(denom, approx=True)           # EUP

        if normalize:
            # Padded lanes are exactly 0 here (zero-padded weights/bias, or 0
            # post-softmax), so sum-of-squares only covers valid features.
            # F.normalize(eps=1e-12) == x * rsqrt(max(sumsq, eps^2)).
            sumsq = jnp.sum(h * h, axis=-1, keepdims=True)
            h = h * lax.rsqrt(jnp.maximum(sumsq, jnp.float32(1e-24)))  # EUP

        if sigmoid:
            h = 0.5 * (lax.tanh(0.5 * h) + 1.0)                 # EUP tanh

        out_ref[...] = h.astype(out_ref.dtype)

    return kernel


def _mlp_fused_call(x, weights, biases, *, relu_last, softmax, normalize, sigmoid,
                    compute_dtype, block_m, vmem_limit, single_buffer,
                    prefer_grid_ge2, out_dtype):
    """One pallas_call over a consecutive group of layers (weights VMEM-resident)."""
    num_linear = len(weights)
    B, in_dim = x.shape
    out_dim = weights[-1].shape[1]

    dims = [in_dim] + [w.shape[1] for w in weights]
    dims_p = [_round_up(d, 128) for d in dims]
    in_pad, out_pad = dims_p[0], dims_p[-1]

    # Guard vreg/spill pressure from wide live f32 activations.
    bm = min(block_m, 256) if max(dims_p) >= 1024 else block_m

    # Balance TM across ceil(B / bm) tiles (bounds padding waste to <16 rows/tile).
    n_tiles = max(1, _cdiv(B, bm))
    if prefer_grid_ge2 and B > 16:
        n_tiles = max(n_tiles, 2)          # use both TensorCores on v7x-like chips
    tm = _round_up(_cdiv(B, n_tiles), 16)  # 16-row min (bf16 sublane packing)
    b_pad = _round_up(B, tm)
    grid = (b_pad // tm,)

    x_p = jnp.pad(x.astype(compute_dtype),
                  ((0, b_pad - B), (0, in_pad - in_dim)))

    w_p, bias_p = [], []
    for i, (w, b) in enumerate(zip(weights, biases)):
        w_p.append(jnp.pad(w.astype(compute_dtype),
                           ((0, dims_p[i] - w.shape[0]),
                            (0, dims_p[i + 1] - w.shape[1]))))
        # Final-layer bias padded with -1e30 when softmax: masks padded lanes for
        # free. All other pads stay 0 so padded lanes are mathematically inert.
        pad_val = -1e30 if (softmax and i == num_linear - 1) else 0.0
        bias_p.append(jnp.pad(b.astype(jnp.float32),
                              (0, dims_p[i + 1] - b.shape[0]),
                              constant_values=pad_val).reshape(1, -1))

    def resident_spec(shape):
        if single_buffer:
            return pl.BlockSpec(shape, lambda i: (0, 0),
                                pipeline_mode=pl.Buffered(1))
        return pl.BlockSpec(shape, lambda i: (0, 0))

    x_spec = pl.BlockSpec((tm, in_pad), lambda i: (i, 0))
    w_specs = [resident_spec(w.shape) for w in w_p]        # VMEM-resident
    b_specs = [resident_spec(b.shape) for b in bias_p]     # VMEM-resident
    out_spec = pl.BlockSpec((tm, out_pad), lambda i: (i, 0))

    kernel = _make_kernel(num_linear, relu_last, softmax, normalize, sigmoid,
                          compute_dtype)

    flops = 2 * b_pad * sum(dims_p[i] * dims_p[i + 1] for i in range(num_linear))
    bytes_accessed = (x_p.size * x_p.dtype.itemsize
                      + sum(w.size * w.dtype.itemsize for w in w_p)
                      + sum(b.size * b.dtype.itemsize for b in bias_p)
                      + b_pad * out_pad * jnp.dtype(out_dtype).itemsize)
    transcendentals = b_pad * out_pad * (int(softmax) + int(sigmoid))

    out = pl.pallas_call(
        kernel,
        out_shape=jax.ShapeDtypeStruct((b_pad, out_pad), out_dtype),
        grid=grid,
        in_specs=[x_spec] + w_specs + b_specs,
        out_specs=out_spec,
        compiler_params=pltpu.CompilerParams(
            dimension_semantics=("parallel",),
            vmem_limit_bytes=int(vmem_limit),
        ),
        cost_estimate=pl.CostEstimate(flops=flops,
                                      transcendentals=transcendentals,
                                      bytes_accessed=bytes_accessed),
    )(x_p, *w_p, *bias_p)

    return out[:B, :out_dim]


def mlp_pallas(x, weights, biases, *, softmax=False, normalize=False, sigmoid=False,
               compute_dtype=jnp.bfloat16, block_m=None, max_resident_bytes=None):
    """x: [B, in_dim]; weights[i]: [d_in_i, d_out_i]; biases[i]: [d_out_i]."""
    num_linear = len(weights)
    assert num_linear >= 1 and len(biases) == num_linear

    # Generation-aware sizing.
    vmem_phys = _tpu_vmem_bytes()
    small_vmem = vmem_phys <= 96 * 1024 * 1024          # v7x-like (64 MiB / TC)
    vmem_limit = min(int(0.75 * vmem_phys), 100 * 1024 * 1024)

    dims_p = ([_round_up(x.shape[1], 128)]
              + [_round_up(w.shape[1], 128) for w in weights])
    if block_m is None:
        if small_vmem:
            block_m = 256
        elif max(dims_p) <= 512:
            block_m = 1024
        else:
            block_m = 512

    single_buffer = _buffered_one_supported()
    buf_factor = 1 if single_buffer else 2

    def resident_bytes(idxs):
        total = 0
        for j in idxs:
            total += dims_p[j] * dims_p[j + 1] * jnp.dtype(compute_dtype).itemsize
            total += dims_p[j + 1] * 4                  # f32 bias row
        return total * buf_factor

    budget = (int(max_resident_bytes) if max_resident_bytes is not None
              else int(0.6 * vmem_limit))

    # Greedily group consecutive layers whose resident (padded) weights fit the
    # VMEM budget; each group becomes one fused pallas_call.
    chunks, cur = [], []
    for i in range(num_linear):
        if cur and resident_bytes(cur + [i]) > budget:
            chunks.append(cur)
            cur = [i]
        else:
            cur = cur + [i]
    chunks.append(cur)
    # TODO(synk): a single layer wider than the budget would need N-axis tiling of
    # its weight with an accumulator grid dim; not required at these sizes.

    h = x
    for ci, chunk in enumerate(chunks):
        is_last_chunk = ci == len(chunks) - 1
        h = _mlp_fused_call(
            h,
            [weights[j] for j in chunk],
            [biases[j] for j in chunk],
            relu_last=not is_last_chunk,
            softmax=softmax and is_last_chunk,
            normalize=normalize and is_last_chunk,
            sigmoid=sigmoid and is_last_chunk,
            compute_dtype=compute_dtype,
            block_m=block_m,
            vmem_limit=vmem_limit,
            single_buffer=single_buffer,
            prefer_grid_ge2=small_vmem,
            out_dtype=(x.dtype if is_last_chunk else compute_dtype),
        )
    return h


def mlp_ref(x, weights, biases, *, softmax=False, normalize=False, sigmoid=False,
            mimic_dtype=None):
    """Pure-JAX reference. mimic_dtype=bf16 mirrors the kernel's matmul dtype."""
    cast = (lambda a: a.astype(mimic_dtype)) if mimic_dtype is not None \
        else (lambda a: a.astype(jnp.float32))
    h = cast(x)
    for i, (w, b) in enumerate(zip(weights, biases)):
        h = jnp.dot(h, cast(w), preferred_element_type=jnp.float32) \
            + b.astype(jnp.float32)
        if i < len(weights) - 1:
            h = cast(jnp.maximum(h, 0.0))
    h = h.astype(jnp.float32)
    if softmax:
        h = jax.nn.softmax(h, axis=1)
    if normalize:
        h = h / jnp.maximum(jnp.linalg.norm(h, axis=1, keepdims=True), 1e-12)
    if sigmoid:
        h = jax.nn.sigmoid(h)
    return h.astype(x.dtype)


def init_params(key, in_dim, embed_dim, out_dim, num_layers):
    """PyTorch-style uniform(+-1/sqrt(fan_in)) init; weights stored [in, out]."""
    dims = [in_dim] + [embed_dim] * (num_layers + 1) + [out_dim]
    weights, biases = [], []
    for i in range(len(dims) - 1):
        d_in, d_out = dims[i], dims[i + 1]
        key, kw, kb = jax.random.split(key, 3)
        bound = 1.0 / jnp.sqrt(d_in)
        weights.append(jax.random.uniform(kw, (d_in, d_out), jnp.float32,
                                          minval=-bound, maxval=bound))
        biases.append(jax.random.uniform(kb, (d_out,), jnp.float32,
                                         minval=-bound, maxval=bound))
    return weights, biases


if __name__ == "__main__":
    # Shapes consistent with MLP(in_dim=32, embed_dim=64, out_dim=16, num_layers=1)
    B, in_dim, embed_dim, out_dim, num_layers = 8, 32, 64, 16, 1

    key = jax.random.PRNGKey(0)
    key, kx = jax.random.split(key)
    x = jax.random.normal(kx, (B, in_dim), jnp.float32)
    weights, biases = init_params(key, in_dim, embed_dim, out_dim, num_layers)

    configs = [
        dict(softmax=False, normalize=False, sigmoid=False),
        dict(softmax=True, normalize=False, sigmoid=True),
        dict(softmax=False, normalize=True, sigmoid=False),
    ]
    for cfg in configs:
        out = mlp_pallas(x, weights, biases, **cfg)
        jax.block_until_ready(out)
        # Tight check vs. a bf16-mimicking reference (same matmul dtype as kernel).
        ref_bf16 = mlp_ref(x, weights, biases, mimic_dtype=jnp.bfloat16, **cfg)
        assert jnp.allclose(out, ref_bf16, atol=5e-3, rtol=5e-3), cfg
        # Loose sanity check vs. the full-f32 PyTorch-equivalent reference.
        ref_f32 = mlp_ref(x, weights, biases, **cfg)
        assert jnp.allclose(out, ref_f32, atol=5e-2, rtol=5e-2), cfg

    # Exercise the chained fallback (resident weights over budget -> per-layer calls),
    # i.e. the path large MLPs would take on v7x's 64 MiB VMEM.
    cfg = dict(softmax=True, normalize=False, sigmoid=False)
    out_split = mlp_pallas(x, weights, biases, max_resident_bytes=1, **cfg)
    jax.block_until_ready(out_split)
    ref_bf16 = mlp_ref(x, weights, biases, mimic_dtype=jnp.bfloat16, **cfg)
    assert jnp.allclose(out_split, ref_bf16, atol=5e-3, rtol=5e-3)

    print("KERNEL_OK")
</pallas_src>

<mosaic_0001>
module attributes {stable_mosaic.version = 11 : i64} {
  func.func @k(%arg0: i32, %arg1: memref<8x128xf32, #tpu.memory_space<vmem>>, %arg2: memref<8x128xf32, #tpu.memory_space<vmem>>) attributes {dimension_semantics = [#tpu.dimension_semantics<arbitrary>], iteration_bounds = array<i64: 2>, scalar_prefetch = 0 : i64, scratch_operands = 0 : i64, tpu.core_type = #tpu.core_type<tc>, window_params = [{pipeline_mode = #tpu.pipeline_mode<synchronous>, transform_indices = @transform_0, window_bounds = array<i64: 8, 128>}, {transform_indices = @transform_1, window_bounds = array<i64: 8, 128>}]} {
    %c0 = arith.constant 0 : index
    %c0_0 = arith.constant 0 : index
    %0 = vector.load %arg1[%c0, %c0_0] : memref<8x128xf32, #tpu.memory_space<vmem>>, vector<8x128xf32>
    %cst = arith.constant 2.000000e+00 : f32
    %1 = vector.broadcast %cst : f32 to vector<8x128xf32>
    %2 = arith.mulf %0, %1 : vector<8x128xf32>
    %c0_1 = arith.constant 0 : index
    %c0_2 = arith.constant 0 : index
    %3 = vector.load %arg2[%c0_1, %c0_2] : memref<8x128xf32, #tpu.memory_space<vmem>>, vector<8x128xf32>
    tpu.vector_store %arg2[%c0_1, %c0_2], %2 {strides = array<i32>} : memref<8x128xf32, #tpu.memory_space<vmem>>, vector<8x128xf32>,
    return
  }
  func.func @transform_0(%arg0: i32) -> (i32, i32) {
    %c0_i32 = arith.constant 0 : i32
    %c0_i32_0 = arith.constant 0 : i32
    %c0_i32_1 = arith.constant 0 : i32
    return %c0_i32, %c0_i32_0 : i32, i32
  }
  func.func @transform_1(%arg0: i32) -> (i32, i32) {
    %c0_i32 = arith.constant 0 : i32
    %c0_i32_0 = arith.constant 0 : i32
    return %arg0, %c0_i32 : i32, i32
  }
}

module attributes {stable_mosaic.version = 11 : i64} {
  func.func @kernel(%arg0: i32, %arg1: memref<16x128xbf16, #tpu.memory_space<vmem>>, %arg2: memref<128x128xbf16, #tpu.memory_space<vmem>>, %arg3: memref<128x128xbf16, #tpu.memory_space<vmem>>, %arg4: memref<128x128xbf16, #tpu.memory_space<vmem>>, %arg5: memref<1x128xf32, #tpu.memory_space<vmem>>, %arg6: memref<1x128xf32, #tpu.memory_space<vmem>>, %arg7: memref<1x128xf32, #tpu.memory_space<vmem>>, %arg8: memref<16x128xf32, #tpu.memory_space<vmem>>) attributes {dimension_semantics = [#tpu.dimension_semantics<parallel>], iteration_bounds = array<i64: 1>, scalar_prefetch = 0 : i64, scratch_operands = 0 : i64, tpu.core_type = #tpu.core_type<tc>, window_params = [{transform_indices = @transform_0, window_bounds = array<i64: 16, 128>}, {pipeline_mode = #tpu.pipeline_mode<synchronous>, transform_indices = @transform_1, window_bounds = array<i64: 128, 128>}, {pipeline_mode = #tpu.pipeline_mode<synchronous>, transform_indices = @transform_2, window_bounds = array<i64: 128, 128>}, {pipeline_mode = #tpu.pipeline_mode<synchronous>, transform_indices = @transform_3, window_bounds = array<i64: 128, 128>}, {pipeline_mode = #tpu.pipeline_mode<synchronous>, transform_indices = @transform_4, window_bounds = array<i64: 1, 128>}, {pipeline_mode = #tpu.pipeline_mode<synchronous>, transform_indices = @transform_5, window_bounds = array<i64: 1, 128>}, {pipeline_mode = #tpu.pipeline_mode<synchronous>, transform_indices = @transform_6, window_bounds = array<i64: 1, 128>}, {transform_indices = @transform_7, window_bounds = array<i64: 16, 128>}]} {
    %c0 = arith.constant 0 : index
    %c0_0 = arith.constant 0 : index
    %0 = vector.load %arg1[%c0, %c0_0] : memref<16x128xbf16, #tpu.memory_space<vmem>>, vector<16x128xbf16>
    %c0_1 = arith.constant 0 : index
    %c0_2 = arith.constant 0 : index
    %1 = vector.load %arg2[%c0_1, %c0_2] : memref<128x128xbf16, #tpu.memory_space<vmem>>, vector<128x128xbf16>
    %cst = arith.constant dense<0.000000e+00> : vector<16x128xf32>
    %2 = tpu.matmul %0, %1, %cst {dimension_numbers = #tpu.dot_dimension_numbers<[1], [0], [0], [1], [0, 0, 1, 1], [], []>} : vector<16x128xbf16>, vector<128x128xbf16>, vector<16x128xf32> -> vector<16x128xf32>
    %c0_3 = arith.constant 0 : index
    %c0_4 = arith.constant 0 : index
    %3 = vector.load %arg5[%c0_3, %c0_4] : memref<1x128xf32, #tpu.memory_space<vmem>>, vector<1x128xf32>
    %4 = vector.broadcast %3 : vector<1x128xf32> to vector<16x128xf32>
    %5 = arith.addf %2, %4 : vector<16x128xf32>
    %cst_5 = arith.constant 0.000000e+00 : f32
    %6 = vector.broadcast %cst_5 : f32 to vector<16x128xf32>
    %7 = arith.maximumf %5, %6 : vector<16x128xf32>
    %8 = arith.truncf %7 : vector<16x128xf32> to vector<16x128xbf16>
    %c0_6 = arith.constant 0 : index
    %c0_7 = arith.constant 0 : index
    %9 = vector.load %arg3[%c0_6, %c0_7] : memref<128x128xbf16, #tpu.memory_space<vmem>>, vector<128x128xbf16>
    %cst_8 = arith.constant dense<0.000000e+00> : vector<16x128xf32>
    %10 = tpu.matmul %8, %9, %cst_8 {dimension_numbers = #tpu.dot_dimension_numbers<[1], [0], [0], [1], [0, 0, 1, 1], [], []>} : vector<16x128xbf16>, vector<128x128xbf16>, vector<16x128xf32> -> vector<16x128xf32>
    %c0_9 = arith.constant 0 : index
    %c0_10 = arith.constant 0 : index
    %11 = vector.load %arg6[%c0_9, %c0_10] : memref<1x128xf32, #tpu.memory_space<vmem>>, vector<1x128xf32>
    %12 = vector.broadcast %11 : vector<1x128xf32> to vector<16x128xf32>
    %13 = arith.addf %10, %12 : vector<16x128xf32>
    %cst_11 = arith.constant 0.000000e+00 : f32
    %14 = vector.broadcast %cst_11 : f32 to vector<16x128xf32>
    %15 = arith.maximumf %13, %14 : vector<16x128xf32>
    %16 = arith.truncf %15 : vector<16x128xf32> to vector<16x128xbf16>
    %c0_12 = arith.constant 0 : index
    %c0_13 = arith.constant 0 : index
    %17 = vector.load %arg4[%c0_12, %c0_13] : memref<128x128xbf16, #tpu.memory_space<vmem>>, vector<128x128xbf16>
    %cst_14 = arith.constant dense<0.000000e+00> : vector<16x128xf32>
    %18 = tpu.matmul %16, %17, %cst_14 {dimension_numbers = #tpu.dot_dimension_numbers<[1], [0], [0], [1], [0, 0, 1, 1], [], []>} : vector<16x128xbf16>, vector<128x128xbf16>, vector<16x128xf32> -> vector<16x128xf32>
    %c0_15 = arith.constant 0 : index
    %c0_16 = arith.constant 0 : index
    %19 = vector.load %arg7[%c0_15, %c0_16] : memref<1x128xf32, #tpu.memory_space<vmem>>, vector<1x128xf32>
    %20 = vector.broadcast %19 : vector<1x128xf32> to vector<16x128xf32>
    %21 = arith.addf %18, %20 : vector<16x128xf32>
    %c0_17 = arith.constant 0 : index
    %c0_18 = arith.constant 0 : index
    %22 = vector.load %arg8[%c0_17, %c0_18] : memref<16x128xf32, #tpu.memory_space<vmem>>, vector<16x128xf32>
    tpu.vector_store %arg8[%c0_17, %c0_18], %21 {strides = array<i32>} : memref<16x128xf32, #tpu.memory_space<vmem>>, vector<16x128xf32>,
    return
  }
  func.func @transform_0(%arg0: i32) -> (i32, i32) {
    %c0_i32 = arith.constant 0 : i32
    %c0_i32_0 = arith.constant 0 : i32
    return %arg0, %c0_i32 : i32, i32
  }
  func.func @transform_1(%arg0: i32) -> (i32, i32) {
    %c0_i32 = arith.constant 0 : i32
    %c0_i32_0 = arith.constant 0 : i32
    %c0_i32_1 = arith.constant 0 : i32
    return %c0_i32, %c0_i32_0 : i32, i32
  }
  func.func @transform_2(%arg0: i32) -> (i32, i32) {
    %c0_i32 = arith.constant 0 : i32
    %c0_i32_0 = arith.constant 0 : i32
    %c0_i32_1 = arith.constant 0 : i32
    return %c0_i32, %c0_i32_0 : i32, i32
  }
  func.func @transform_3(%arg0: i32) -> (i32, i32) {
    %c0_i32 = arith.constant 0 : i32
    %c0_i32_0 = arith.constant 0 : i32
    %c0_i32_1 = arith.constant 0 : i32
    return %c0_i32, %c0_i32_0 : i32, i32
  }
  func.func @transform_4(%arg0: i32) -> (i32, i32) {
    %c0_i32 = arith.constant 0 : i32
    %c0_i32_0 = arith.constant 0 : i32
    %c0_i32_1 = arith.constant 0 : i32
    return %c0_i32, %c0_i32_0 : i32, i32
  }
  func.func @transform_5(%arg0: i32) -> (i32, i32) {
    %c0_i32 = arith.constant 0 : i32
    %c0_i32_0 = arith.constant 0 : i32
    %c0_i32_1 = arith.constant 0 : i32
    return %c0_i32, %c0_i32_0 : i32, i32
  }
  func.func @transform_6(%arg0: i32) -> (i32, i32) {
    %c0_i32 = arith.constant 0 : i32
    %c0_i32_0 = arith.constant 0 : i32
    %c0_i32_1 = arith.constant 0 : i32
    return %c0_i32, %c0_i32_0 : i32, i32
  }
  func.func @transform_7(%arg0: i32) -> (i32, i32) {
    %c0_i32 = arith.constant 0 : i32
    %c0_i32_0 = arith.constant 0 : i32
    return %arg0, %c0_i32 : i32, i32
  }
}

</mosaic_0001>

<bundles_post_ra>
// kernel: tpu_custom_call.1
= control target key start
LH: loop header
LB: loop body
LE: loop exit
PB: predicated region body
PF: predicated region fallthrough
CT: control target
= control target key end

     0   :  { %6 = vsyncpa [#allocation3], 0  ;;  %s482_s0 = inlined_call_operand.hbm [shape: f32[8,128], index: 0, kind: input, shape index: {}]   ;;  %s483_s1 = inlined_call_operand.hbm [shape: f32[16,128], index: 1, kind: output, shape index: {}]  }
   0x1   :  { %7 = vsyncpa [#allocation4], 0 }
   0x2   :  { %9 = vsyncpa [#allocation4 + $0x1], 0  ;;  %s352_s6 = smov 0   ;;  %s354_s7 = smov 0  }
   0x3   :  { %s356_s8 = smov 0   ;;  %s358_s9 = smov 0  }
   0x4 LB: > { %s373_s10 = sadd.s32 4294967295, %s338_s9   ;;  %s184_s11 = sadd.s32 4294967294, %s338_s9   ;;  %s338_s9 = sphi %s358_s9, %s499_s9   ;;  %s334_s8 = sphi %s356_s8, %s498_s8   ;;  %s330_s7 = sphi %s354_s7, %s497_s7   ;;  %s326_s6 = sphi %s352_s6, %s496_s6  }
   0x5   : > { %s377_s12 = sadd.s32 1, %s338_s9   ;;  %s43_s13 = sadd.s32 1, %s334_s8 }
   0x6   : > { %s40_s14 = ssub.s32 %s338_s9, %s377_s12  ;;  %p53_p0 = scmp.ne.s32.totalorder %s334_s8, %s330_s7 }
   0x7   : > { %p41_p1 = scmp.eq.s32.totalorder %s40_s14, 0  ;;  %p54_p2 = scmp.eq.s32.totalorder %s373_s10, 1 }
   0x8   : > { %p59_p3 = scmp.ne.s32.totalorder %s330_s7, %s326_s6  ;;  %p60_p4 = scmp.eq.s32.totalorder %s184_s11, 1 }
   0x9   : > { %s388_s15 = scalar_select %p41_p1, %s334_s8, %s43_s13  }
   0xa   : > { %p390_p5 = por %p54_p2, %p53_p0  ;;  %p394_p6 = por %p60_p4, %p59_p3 }
   0xb   : > { %p185_p7 = scmp.ge.s32.totalorder %s338_s9, 1  ;;  %p67_p8 = scmp.lt.s32.totalorder %s338_s9, 3 }
   0xc   : > { %s487_s16 = scalar_select %p390_p5, 1, 0 }
   0xd   : > { %s488_s17 = scalar_select %p394_p6, 1, 0 }
   0xe   : > { %p484_p9 = scmp.eq.s32.totalorder %s373_s10, 0  ;;  %p401_p10 = pnand %p185_p7, %p67_p8 }
   0xf   : > { %s340_s19 = smov [#allocation2]   ;;  %s244_s24 = scalar_lea.hbm %s482_s0, 128 }
  0x10   : > { %s489_s18 = scalar_select %p401_p10, 1, 0 }
  0x11   : > { %s80_s20 = sshll.u32 %s340_s19, 4  ;;  %p200_p11 = pneg %p401_p10  ;;  %s81_s20 = int_to_ptr.vmem [resolvable:$true] %s80_s20 }
  0x12   : > { %p245_p13 = scmp.ne.s32.totalorder %s482_s0, %s244_s24  ;;  %p251_p3 = scmp.lt.u32.totalorder %s244_s24, %s482_s0 }
  0x13   : > { %p409_p12 = pnand %p484_p9, %p200_p11 }
  0x15   : > { %p246_p0 = pneg %p409_p12 }
  0x17   : > { %p247_p1 = pnand %p246_p0, %p245_p13 }
  0x19   : > { %p248_p2 = pneg %p247_p1 }
  0x1b   : > { %p253_p4 = pnand %p251_p3, %p248_p2 }
  0x1d   : > { %256 = shalt.err (!%p253_p4)
}
  0x1e   : > { %s257_s29 = scalar_lea.vmem %s81_s20, 128  ;;  %p265_p9 = scmp.lt.s32.totalorder %s81_s20, %s81_s20 }
  0x1f   : > { %p258_p7 = scmp.ne.s32.totalorder %s81_s20, %s257_s29  ;;  %p266_p6 = scmp.lt.s32.totalorder %s257_s29, %s257_s29 }
  0x21   : > { %p260_p8 = pnand %p258_p7, %p246_p0  ;;  %p267_p5 = por %p266_p6, %p265_p9 }
  0x23   : > { %p261_p11 = pneg %p260_p8 }
  0x25   : > { %p268_p10 = pnand %p267_p5, %p261_p11 }
  0x27   : > { %271 = shalt.err (!%p268_p10)
}
  0x28   : > { %203 = dma.hbm_to_vmem [thread:$0]  (!%p409_p12), %s482_s0, 128, %s81_s20, [#allocation3]  }
  0x29   : > { %p491_p13 = scmp.ne.s32.totalorder %s489_s18, 0 }
  0x2a   : > { %p492_p1 = scmp.eq.s32.totalorder (!%p491_p13), %s373_s10, 0 }
  0x2b   : > { %93 = sbr.rel (%p491_p13) target bundleno = 77 (0x4d), region = 24 }
  0x32   : > { %317 = dma.done.wait (%p492_p1), [#allocation3], 128   ;;  %p493_p0 = pmov %p492_p1 }
  0x33   : > { %s105_s3 = sand.u32 1, %s330_s7   ;;  %s191_s13 = sshll.u32 %s373_s10, 7  ;;  %v108_v0 = vld [vmem:[#allocation2] sm:$0xff] }
  0x34   : > { %319 = vsyncadd (%p493_p0), [#allocation3], 4294967168  ;;  %s189_s4 = sshll.u32 %s105_s3, 3  ;;  %v109_v1 = vmul.f32 2.0, %v108_v0  ;;  %s442_s19 = scalar_lea.hbm %s483_s1, %s191_s13 }
  0x35   : > { %s107_s5 = scalar_lea.vmem [#allocation5], %s189_s4  ;;  %s112_s20 = scalar_lea.sflag [#allocation4], %s105_s3 }
  0x36   : > { %s125_s11 = sshll.u32 %s107_s5, 4  ;;  %110 = vst [vmem:[%s107_s5] sm:$0xff] %v109_v1  ;;  %p494_p6 = scmp.ne.s32.totalorder %s487_s16, 0  ;;  %s437_s11 = int_to_ptr.vmem [resolvable:$true] %s125_s11 }
  0x37   : > { %s272_s21 = scalar_lea.vmem %s437_s11, 128  ;;  %s341_s10 = smov [#allocation5]  }
  0x38   : > { %p273_p5 = scmp.ne.s32.totalorder %s437_s11, %s272_s21  ;;  %s276_s22 = sshll.u32 %s341_s10, 4  ;;  %s277_s22 = int_to_ptr.vmem [resolvable:$false] %s276_s22 }
  0x39   : > { %s278_s23 = scalar_lea.vmem %s277_s22, 256  ;;  %p279_p12 = scmp.lt.s32.totalorder %s437_s11, %s277_s22 }
  0x3a   : > { %p274_p9 = pnand %p273_p5, %p494_p6  ;;  %p280_p2 = scmp.lt.s32.totalorder %s278_s23, %s272_s21 }
  0x3c   : > { %p275_p10 = pneg %p274_p9  ;;  %p281_p3 = por %p280_p2, %p279_p12 }
  0x3e   : > { %p282_p4 = pnand %p281_p3, %p275_p10 }
  0x40   : > { %285 = shalt.err (!%p282_p4)
}
  0x41   : > { %s286_s24 = scalar_lea.hbm %s442_s19, 128  ;;  %s290_s27 = scalar_lea.hbm %s483_s1, 256 }
  0x42   : > { %p287_p7 = scmp.ne.s32.totalorder %s442_s19, %s286_s24  ;;  %p291_p13 = scmp.lt.u32.totalorder %s442_s19, %s483_s1 }
  0x43   : > { %p292_p1 = scmp.lt.u32.totalorder %s290_s27, %s286_s24  ;;  %p294_p5 = scmp.lt.u32.totalorder %s286_s24, %s442_s19 }
  0x44   : > { %p288_p8 = pnand %p287_p7, %p494_p6 }
  0x45   : > { %p293_p0 = por %p292_p1, %p291_p13 }
  0x46   : > { %p289_p11 = pneg %p288_p8 }
  0x47   : > { %p295_p9 = por %p294_p5, %p293_p0 }
  0x49   : > { %p296_p10 = pnand %p295_p9, %p289_p11 }
  0x4b   : > { %299 = shalt.err (!%p296_p10)
}
  0x4c   : > { %198 = dma.vmem_to_hbm [thread:$0]  (%p494_p6), %s437_s11, 128, %s442_s19, %s112_s20  }
  0x4d PF: > { %p210_p12 = scmp.ge.s32.totalorder %s338_s9, 2  ;;  %s137_s30 = sand.u32 1, %s326_s6  }
  0x4e   : > { %p495_p2 = scmp.ne.s32.totalorder %s488_s17, 0  ;;  %s138_s2 = scalar_lea.sflag [#allocation4], %s137_s30 }
  0x50   : > { %p205_p3 = pnand %p210_p12, %p495_p2 }
  0x52   : > { %321 = dma.done.wait (!%p205_p3), %s138_s2, 128  }
  0x53   : > { %323 = vsyncadd (!%p205_p3), %s138_s2, 4294967168  ;;  %p12_p4 = scmp.ge.s32.totalorder %s377_s12, 4   ;;  %s496_s6 = smov %s330_s7 }
  0x54   : > { %s497_s7 = smov %s334_s8  ;;  %s498_s8 = smov %s388_s15 }
  0x55   : > { %s499_s9 = smov %s377_s12  ;;  %14 = sbr.rel (!%p12_p4) target bundleno = 4 (0x4), region = 61 }
  0x5c   :  { %143 = vsyncpa [#allocation3], 1 }
  0x5d   :  { %145 = vsyncpa [#allocation3 + $0x1], 1 }
  0x5e   :  { %146 = vsyncpa [#allocation4], 1 }
  0x5f   :  { %148 = vsyncpa [#allocation4 + $0x1], 1 }

// kernel: tpu_custom_call.1
= control target key start
LH: loop header
LB: loop body
LE: loop exit
PB: predicated region body
PF: predicated region fallthrough
CT: control target
= control target key end

     0   :  { %12 = vsyncpa [#allocation3], 0  ;;  %s1035_s0 = inlined_call_operand.hbm [shape: bf16[16,128], index: 0, kind: input, shape index: {}]   ;;  %s1036_s1 = inlined_call_operand.hbm [shape: bf16[128,128], index: 1, kind: input, shape index: {}]   ;;  %s1037_s2 = inlined_call_operand.hbm [shape: bf16[128,128], index: 2, kind: input, shape index: {}]   ;;  %s1038_s3 = inlined_call_operand.hbm [shape: bf16[128,128], index: 3, kind: input, shape index: {}]   ;;  %s1039_s4 = inlined_call_operand.hbm [shape: f32[1,128], index: 4, kind: input, shape index: {}]   ;;  %s1040_s5 = inlined_call_operand.hbm [shape: f32[1,128], index: 5, kind: input, shape index: {}]   ;;  %s1041_s6 = inlined_call_operand.hbm [shape: f32[1,128], index: 6, kind: input, shape index: {}]   ;;  %s1042_s7 = inlined_call_operand.hbm [shape: f32[16,128], index: 7, kind: output, shape index: {}]  }
   0x1   :  { %13 = vsyncpa [#allocation6], 0 }
   0x2   :  { %14 = vsyncpa [#allocation9], 0 }
   0x3   :  { %15 = vsyncpa [#allocation12], 0 }
   0x4   :  { %16 = vsyncpa [#allocation4], 0  ;;  %s829_s24 = smov [#allocation5]   ;;  %s830_s26 = smov [#allocation8]  }
   0x5   :  { %s34_s25 = sshll.u32 %s829_s24, 4  ;;  %s58_s27 = sshll.u32 %s830_s26, 4  ;;  %s35_s25 = int_to_ptr.vmem [resolvable:$true] %s34_s25  ;;  %s883_s27 = int_to_ptr.vmem [resolvable:$true] %s58_s27 }
   0x6   :  { %s643_s30 = scalar_lea.hbm %s1036_s1, 1024 }
   0x7   :  { %p644_p0 = scmp.ne.s32.totalorder %s1036_s1, %s643_s30  ;;  %p647_p1 = scmp.lt.u32.totalorder %s643_s30, %s1036_s1 }
   0x9   :  { %p649_p2 = pnand %p647_p1, %p644_p0 }
   0xb   :  { %652 = shalt.err (!%p649_p2)
}
   0xc   :  { %s653_s12 = scalar_lea.vmem %s35_s25, 1024  ;;  %p658_p4 = scmp.lt.s32.totalorder %s35_s25, %s35_s25 }
   0xd   :  { %p654_p3 = scmp.ne.s32.totalorder %s35_s25, %s653_s12  ;;  %p659_p5 = scmp.lt.s32.totalorder %s653_s12, %s653_s12 }
   0xf   :  { %p660_p6 = por %p659_p5, %p658_p4 }
  0x11   :  { %p661_p7 = pnand %p660_p6, %p654_p3 }
  0x13   :  { %664 = shalt.err (!%p661_p7)
}
  0x14   :  { %s831_s13 = smov 64   ;;  %s832_s14 = smov 4  }
  0x15   :  { %40 = dma.hbm_to_vmem [thread:$0]  %s1036_s1, 1024, %s35_s25, [#allocation6], %s831_s13, %s831_s13, %s832_s14  }
  0x16   :  { %s665_s19 = scalar_lea.hbm %s1038_s3, 1024 }
  0x17   :  { %p666_p8 = scmp.ne.s32.totalorder %s1038_s3, %s665_s19  ;;  %p669_p9 = scmp.lt.u32.totalorder %s665_s19, %s1038_s3 }
  0x19   :  { %p671_p10 = pnand %p669_p9, %p666_p8 }
  0x1b   :  { %674 = shalt.err (!%p671_p10)
}
  0x1c   :  { %s675_s24 = scalar_lea.vmem %s883_s27, 1024  ;;  %p680_p12 = scmp.lt.s32.totalorder %s883_s27, %s883_s27 }
  0x1d   :  { %p676_p11 = scmp.ne.s32.totalorder %s883_s27, %s675_s24  ;;  %p681_p13 = scmp.lt.s32.totalorder %s675_s24, %s675_s24 }
  0x1f   :  { %p682_p0 = por %p681_p13, %p680_p12 }
  0x21   :  { %p683_p1 = pnand %p682_p0, %p676_p11 }
  0x23   :  { %686 = shalt.err (!%p683_p1)
}
  0x24   :  { %64 = dma.hbm_to_vmem [thread:$0]  %s1038_s3, 1024, %s883_s27, [#allocation9], %s831_s13, %s831_s13, %s832_s14  }
  0x25   :  { %s833_s26 = smov [#allocation11]   ;;  %s834_s29 = smov [#allocation2]  }
  0x26   :  { %s81_s28 = sshll.u32 %s833_s26, 4  ;;  %s22_s30 = sshll.u32 %s834_s29, 4  ;;  %s82_s28 = int_to_ptr.vmem [resolvable:$true] %s81_s28  ;;  %s920_s30 = int_to_ptr.vmem [resolvable:$true] %s22_s30 }
  0x27   :  { %s687_s10 = scalar_lea.hbm %s1040_s5, 16 }
  0x28   :  { %p688_p2 = scmp.ne.s32.totalorder %s1040_s5, %s687_s10  ;;  %p691_p3 = scmp.lt.u32.totalorder %s687_s10, %s1040_s5 }
  0x2a   :  { %p693_p4 = pnand %p691_p3, %p688_p2 }
  0x2c   :  { %696 = shalt.err (!%p693_p4)
}
  0x2d   :  { %s697_s3 = scalar_lea.vmem %s82_s28, 16  ;;  %s701_s27 = scalar_lea.vmem %s82_s28, 32 }
  0x2e   :  { %p698_p5 = scmp.ne.s32.totalorder %s82_s28, %s697_s3  ;;  %p702_p6 = scmp.lt.s32.totalorder %s82_s28, %s82_s28 }
  0x2f   :  { %p703_p7 = scmp.lt.s32.totalorder %s701_s27, %s697_s3 }
  0x31   :  { %p704_p8 = por %p703_p7, %p702_p6 }
  0x33   :  { %p705_p9 = pnand %p704_p8, %p698_p5 }
  0x35   :  { %708 = shalt.err (!%p705_p9)
}
  0x36   :  { %84 = dma.hbm_to_vmem [thread:$0]  %s1040_s5, 16, %s82_s28, [#allocation12]  }
  0x37   :  { %s709_s21 = scalar_lea.hbm %s1035_s0, 128 }
  0x38   :  { %p710_p10 = scmp.ne.s32.totalorder %s1035_s0, %s709_s21  ;;  %p713_p11 = scmp.lt.u32.totalorder %s709_s21, %s1035_s0 }
  0x3a   :  { %p715_p12 = pnand %p713_p11, %p710_p10 }
  0x3c   :  { %718 = shalt.err (!%p715_p12)
}
  0x3d   :  { %s719_s25 = scalar_lea.vmem %s920_s30, 128  ;;  %p724_p0 = scmp.lt.s32.totalorder %s920_s30, %s920_s30 }
  0x3e   :  { %p720_p13 = scmp.ne.s32.totalorder %s920_s30, %s719_s25  ;;  %p725_p1 = scmp.lt.s32.totalorder %s719_s25, %s719_s25 }
  0x40   :  { %p726_p2 = por %p725_p1, %p724_p0 }
  0x42   :  { %p727_p3 = pnand %p726_p2, %p720_p13 }
  0x44   :  { %730 = shalt.err (!%p727_p3)
}
  0x45   :  { %28 = dma.hbm_to_vmem [thread:$0]  %s1035_s0, 128, %s920_s30, [#allocation3], %s831_s13, %s831_s13, %s832_s14  }
  0x46   :  { %s835_s28 = smov [#allocation7]   ;;  %s836_s8 = smov [#allocation10]  }
  0x47   :  { %s46_s29 = sshll.u32 %s835_s28, 4  ;;  %s71_s9 = sshll.u32 %s836_s8, 4  ;;  %s47_s29 = int_to_ptr.vmem [resolvable:$true] %s46_s29  ;;  %s72_s9 = int_to_ptr.vmem [resolvable:$true] %s71_s9 }
  0x48   :  { %s731_s12 = scalar_lea.hbm %s1037_s2, 1024 }
  0x49   :  { %p732_p4 = scmp.ne.s32.totalorder %s1037_s2, %s731_s12  ;;  %p735_p5 = scmp.lt.u32.totalorder %s731_s12, %s1037_s2 }
  0x4b   :  { %p737_p6 = pnand %p735_p5, %p732_p4 }
  0x4d   :  { %740 = shalt.err (!%p737_p6)
}
  0x4e   :  { %s741_s0 = scalar_lea.vmem %s47_s29, 1024  ;;  %p746_p8 = scmp.lt.s32.totalorder %s47_s29, %s47_s29 }
  0x4f   :  { %p742_p7 = scmp.ne.s32.totalorder %s47_s29, %s741_s0  ;;  %p747_p9 = scmp.lt.s32.totalorder %s741_s0, %s741_s0 }
  0x51   :  { %p748_p10 = por %p747_p9, %p746_p8 }
  0x53   :  { %p749_p11 = pnand %p748_p10, %p742_p7 }
  0x55   :  { %752 = shalt.err (!%p749_p11)
}
  0x56   :  { %52 = dma.hbm_to_vmem [thread:$0]  %s1037_s2, 1024, %s47_s29, [#allocation6], %s831_s13, %s831_s13, %s832_s14  }
  0x57   :  { %s753_s20 = scalar_lea.hbm %s1039_s4, 16 }
  0x58   :  { %p754_p12 = scmp.ne.s32.totalorder %s1039_s4, %s753_s20  ;;  %p757_p13 = scmp.lt.u32.totalorder %s753_s20, %s1039_s4 }
  0x5a   :  { %p759_p0 = pnand %p757_p13, %p754_p12 }
  0x5c   :  { %762 = shalt.err (!%p759_p0)
}
  0x5d   :  { %s763_s1 = scalar_lea.vmem %s72_s9, 16  ;;  %s767_s25 = scalar_lea.vmem %s72_s9, 32 }
  0x5e   :  { %p764_p1 = scmp.ne.s32.totalorder %s72_s9, %s763_s1  ;;  %p768_p2 = scmp.lt.s32.totalorder %s72_s9, %s72_s9 }
  0x5f   :  { %p769_p3 = scmp.lt.s32.totalorder %s767_s25, %s763_s1 }
  0x61   :  { %p770_p4 = por %p769_p3, %p768_p2 }
  0x63   :  { %p771_p5 = pnand %p770_p4, %p764_p1 }
  0x65   :  { %774 = shalt.err (!%p771_p5)
}
  0x66   :  { %74 = dma.hbm_to_vmem [thread:$0]  %s1039_s4, 16, %s72_s9, [#allocation9]  }
  0x67   :  { %s837_s14 = smov [#allocation13]   ;;  %s775_s29 = scalar_lea.hbm %s1041_s6, 16 }
  0x68   :  { %s91_s5 = sshll.u32 %s837_s14, 4  ;;  %p776_p6 = scmp.ne.s32.totalorder %s1041_s6, %s775_s29  ;;  %s92_s5 = int_to_ptr.vmem [resolvable:$true] %s91_s5 }
  0x69   :  { %p779_p7 = scmp.lt.u32.totalorder %s775_s29, %s1041_s6 }
  0x6b   :  { %p781_p8 = pnand %p779_p7, %p776_p6 }
  0x6d   :  { %784 = shalt.err (!%p781_p8)
}
  0x6e   :  { %s785_s15 = scalar_lea.vmem %s92_s5, 16  ;;  %s789_s4 = scalar_lea.vmem %s92_s5, 32 }
  0x6f   :  { %p786_p9 = scmp.ne.s32.totalorder %s92_s5, %s785_s15  ;;  %p790_p10 = scmp.lt.s32.totalorder %s92_s5, %s92_s5 }
  0x70   :  { %p791_p11 = scmp.lt.s32.totalorder %s789_s4, %s785_s15 }
  0x72   :  { %p792_p12 = por %p791_p11, %p790_p10 }
  0x74   :  { %p793_p13 = pnand %p792_p12, %p786_p9 }
  0x76   :  { %796 = shalt.err (!%p793_p13)
}
  0x77   :  { %94 = dma.hbm_to_vmem [thread:$0]  %s1041_s6, 16, %s92_s5, [#allocation12]  }
  0x78   :  { %819 = dma.done.wait [#allocation3], 128  }
  0x79   :  { %820 = vsyncadd [#allocation3], 4294967168 }
  0x7a   :  { %821 = dma.done.wait [#allocation6], 2048  }
  0x7b   :  { %822 = vsyncadd [#allocation6], 4294965248 }
  0x7c   :  { %823 = dma.done.wait [#allocation9], 1040  }
  0x7d   :  { %824 = vsyncadd [#allocation9], 4294966256 }
  0x7e   :  { %825 = dma.done.wait [#allocation12], 32  }
  0x7f   :  { %826 = vsyncadd [#allocation12], 4294967264  ;;  %v838_v0 = vmov 0.0   ;;  %vm839_vm0 = vmmov 0   ;;  %v618_v1 = vld [vmem:[#allocation5] sm:$0xff]   ;;  %v619_v2 = vld [vmem:[#allocation5 + $0x8] sm:$0xff]  }
  0x80   :  { %544 = vmatprep.subr.bf16.mxu0 %v838_v0  ;;  %560 = vmatprep.mubr.msk.bf16.mxu0 %vm839_vm0, %v838_v0  ;;  %v620_v3 = vld [vmem:[#allocation5 + $0x10] sm:$0xff]   ;;  %v627_v4 = vld [vmem:[#allocation7] sm:$0xff]   ;;  %v621_v5 = vld [vmem:[#allocation5 + $0x18] sm:$0xff]   ;;  %s840_s6 = smov [#allocation14]  }
  0x81   :  { %564 = vmatprep.subr.bf16.mxu1 %v838_v0  ;;  %580 = vmatprep.mubr.msk.bf16.mxu1 %vm839_vm0, %v838_v0  ;;  %v628_v6 = vld [vmem:[#allocation7 + $0x8] sm:$0xff]   ;;  %v622_v7 = vld [vmem:[#allocation5 + $0x20] sm:$0xff]   ;;  %v629_v8 = vld [vmem:[#allocation7 + $0x10] sm:$0xff]   ;;  %s474_s3 = sshll.u32 %s840_s6, 4  ;;  %s475_s3 = int_to_ptr.vmem [resolvable:$true] %s474_s3 }
  0x82   :  { %545 = vmatpush3.bf16.msra.mxu0 %v618_v1  ;;  %565 = vmatpush3.bf16.msra.mxu1 %v627_v4  ;;  %v623_v9 = vld [vmem:[#allocation5 + $0x28] sm:$0xff]   ;;  %v630_v10 = vld [vmem:[#allocation7 + $0x18] sm:$0xff]   ;;  %v624_v11 = vld [vmem:[#allocation5 + $0x30] sm:$0xff]   ;;  %s797_s27 = scalar_lea.vmem %s475_s3, 256  ;;  %p802_p1 = scmp.lt.s32.totalorder %s475_s3, %s475_s3 }
  0x83   :  { %546 = vmatprep.subr.bf16.mxu0 %v838_v0  ;;  %566 = vmatprep.subr.bf16.mxu1 %v838_v0  ;;  %v631_v12 = vld [vmem:[#allocation7 + $0x20] sm:$0xff]   ;;  %v625_v13 = vld [vmem:[#allocation5 + $0x38] sm:$0xff]   ;;  %v632_v14 = vld [vmem:[#allocation7 + $0x28] sm:$0xff]   ;;  %p798_p0 = scmp.ne.s32.totalorder %s475_s3, %s797_s27  ;;  %p803_p2 = scmp.lt.s32.totalorder %s797_s27, %s797_s27 }
  0x84   :  { %v626_v15 = vld [vmem:[#allocation2] sm:$0xff]   ;;  %v633_v16 = vld [vmem:[#allocation7 + $0x30] sm:$0xff]   ;;  %v635_v18 = vld [vmem:[#allocation8] sm:$0xff]  }
  0x85   :  { %v634_v17 = vld [vmem:[#allocation7 + $0x38] sm:$0xff]   ;;  %v636_v19 = vld [vmem:[#allocation8 + $0x8] sm:$0xff]   ;;  %v637_v20 = vld [vmem:[#allocation8 + $0x10] sm:$0xff]   ;;  %p804_p3 = por %p803_p2, %p802_p1 }
  0x86   :  { %547 = vmatpush3.bf16.msra.mxu0 %v619_v2  ;;  %567 = vmatpush3.bf16.msra.mxu1 %v628_v6  ;;  %v638_v21 = vld [vmem:[#allocation8 + $0x18] sm:$0xff]   ;;  %v639_v22 = vld [vmem:[#allocation8 + $0x20] sm:$0xff]   ;;  %v640_v23 = vld [vmem:[#allocation8 + $0x28] sm:$0xff]  }
  0x87   :  { %548 = vmatprep.subr.bf16.mxu0 %v838_v0  ;;  %568 = vmatprep.subr.bf16.mxu1 %v838_v0  ;;  %v489_v24 = vld [vmem:[#allocation10] ss:$0 sm:$0xff]  ;;  %v641_v34 = vld [vmem:[#allocation8 + $0x30] sm:$0xff]   ;;  %v642_v35 = vld [vmem:[#allocation8 + $0x38] sm:$0xff]   ;;  %p805_p4 = pnand %p804_p3, %p798_p0 }
  0x88   :  { %v499_v36 = vld [vmem:[#allocation11] ss:$0 sm:$0xff]  ;;  %v508_v46 = vld [vmem:[#allocation13] ss:$0 sm:$0xff] }
  0x8a   :  { %549 = vmatpush3.bf16.msra.mxu0 %v620_v3  ;;  %569 = vmatpush3.bf16.msra.mxu1 %v629_v8 }
  0x8b   :  { %550 = vmatprep.subr.bf16.mxu0 %v838_v0  ;;  %570 = vmatprep.subr.bf16.mxu1 %v838_v0 }
  0x8e   :  { %551 = vmatpush3.bf16.msra.mxu0 %v621_v5  ;;  %571 = vmatpush3.bf16.msra.mxu1 %v630_v10 }
  0x8f   :  { %552 = vmatprep.subr.bf16.mxu0 %v838_v0  ;;  %572 = vmatprep.subr.bf16.mxu1 %v838_v0 }
  0x92   :  { %553 = vmatpush3.bf16.msra.mxu0 %v622_v7  ;;  %573 = vmatpush3.bf16.msra.mxu1 %v631_v12 }
  0x93   :  { %554 = vmatprep.subr.bf16.mxu0 %v838_v0  ;;  %574 = vmatprep.subr.bf16.mxu1 %v838_v0 }
  0x96   :  { %555 = vmatpush3.bf16.msra.mxu0 %v623_v9  ;;  %575 = vmatpush3.bf16.msra.mxu1 %v632_v14 }
  0x97   :  { %556 = vmatprep.subr.bf16.mxu0 %v838_v0  ;;  %576 = vmatprep.subr.bf16.mxu1 %v838_v0 }
  0x9a   :  { %557 = vmatpush3.bf16.msra.mxu0 %v624_v11  ;;  %577 = vmatpush3.bf16.msra.mxu1 %v633_v16 }
  0x9b   :  { %558 = vmatprep.subr.bf16.mxu0 %v838_v0  ;;  %578 = vmatprep.subr.bf16.mxu1 %v838_v0 }
  0x9e   :  { %559 = vmatpush3.bf16.msra.mxu0 %v625_v13  ;;  %579 = vmatpush3.bf16.msra.mxu1 %v634_v17 }
  0x9f   :  { %584 = vmatprep.subr.bf16.mxu0 %v838_v0 }
  0xa1   :  { %561 = vmatmul.mubr.bf16.vlgmr.msra.gmra.mrb[0].mxu0 %v626_v15 }
  0xa2   :  { %600 = vmatprep.mubr.msk.bf16.mxu0 %vm839_vm0, %v838_v0  ;;  %585 = vmatpush3.bf16.msra.mxu0 %v635_v18 }
  0xa3   :  { %586 = vmatprep.subr.bf16.mxu0 %v838_v0 }
  0xa6   :  { %587 = vmatpush3.bf16.msra.mxu0 %v636_v19 }
  0xa7   :  { %588 = vmatprep.subr.bf16.mxu0 %v838_v0 }
  0xaa   :  { %589 = vmatpush3.bf16.msra.mxu0 %v637_v20 }
  0xab   :  { %590 = vmatprep.subr.bf16.mxu0 %v838_v0 }
  0xae   :  { %591 = vmatpush3.bf16.msra.mxu0 %v638_v21 }
  0xaf   :  { %592 = vmatprep.subr.bf16.mxu0 %v838_v0 }
  0xb2   :  { %593 = vmatpush3.bf16.msra.mxu0 %v639_v22 }
  0xb3   :  { %594 = vmatprep.subr.bf16.mxu0 %v838_v0 }
  0xb6   :  { %595 = vmatpush3.bf16.msra.mxu0 %v640_v23 }
  0xb7   :  { %596 = vmatprep.subr.bf16.mxu0 %v838_v0 }
  0xba   :  { %597 = vmatpush3.bf16.msra.mxu0 %v641_v34 }
  0xbb   :  { %598 = vmatprep.subr.bf16.mxu0 %v838_v0 }
  0xbe   :  { %599 = vmatpush3.bf16.msra.mxu0 %v642_v35 }
 0x174   :  { %v230_v25 = vpop.f32.mrb[0].mxu0 }
 0x175   :  { %v231_v26 = vadd.f32 %v489_v24, %v230_v25  ;;  %v562_v27 = vpop.f32.mrb[1].mxu0 }
 0x176   :  { %v233_v28 = vpop.f32.mrb[2].mxu0 }
 0x177   :  { %v234_v29 = vadd.f32 %v489_v24, %v233_v28  ;;  %v563_v30 = vpop.f32.mrb[3].mxu0  ;;  %v237_v31 = vmax.f32 %v231_v26, 0.0 }
 0x179   :  { %v238_v32 = vmax.f32 %v234_v29, 0.0 }
 0x17b   :  { %v239_v33 = vpack.c.bf16 %v238_v32, %v237_v31 }
 0x17d   :  { %581 = vmatmul.mubr.bf16.vlgmr.msra.gmra.mrb[0].mxu1 %v239_v33 }
 0x250   :  { %v345_v37 = vpop.f32.mrb[0].mxu1 }
 0x251   :  { %v346_v38 = vadd.f32 %v499_v36, %v345_v37  ;;  %v582_v39 = vpop.f32.mrb[1].mxu1 }
 0x252   :  { %v348_v40 = vpop.f32.mrb[2].mxu1 }
 0x253   :  { %v349_v41 = vadd.f32 %v499_v36, %v348_v40  ;;  %v583_v42 = vpop.f32.mrb[3].mxu1  ;;  %v352_v43 = vmax.f32 %v346_v38, 0.0 }
 0x255   :  { %v353_v44 = vmax.f32 %v349_v41, 0.0 }
 0x257   :  { %v354_v45 = vpack.c.bf16 %v353_v44, %v352_v43 }
 0x259   :  { %601 = vmatmul.mubr.bf16.vlgmr.msra.gmra.mrb[4].mxu0 %v354_v45 }
 0x32c   :  { %v460_v47 = vpop.f32.mrb[4].mxu0 }
 0x32d   :  { %v461_v48 = vadd.f32 %v508_v46, %v460_v47  ;;  %v602_v49 = vpop.f32.mrb[5].mxu0 }
 0x32e   :  { %v463_v50 = vpop.f32.mrb[6].mxu0 }
 0x32f   :  { %467 = vst [vmem:[#allocation14] sm:$0xff] %v461_v48  ;;  %v464_v51 = vadd.f32 %v508_v46, %v463_v50  ;;  %v603_v52 = vpop.f32.mrb[7].mxu0 }
 0x331   :  { %468 = vst [vmem:[#allocation14 + $0x8] sm:$0xff] %v464_v51 }
 0x332   :  { %808 = shalt.err (!%p805_p4)
}
 0x333   :  { %s809_s17 = scalar_lea.hbm %s1042_s7, 256 }
 0x334   :  { %p810_p5 = scmp.ne.s32.totalorder %s1042_s7, %s809_s17  ;;  %p813_p6 = scmp.lt.u32.totalorder %s809_s17, %s1042_s7 }
 0x336   :  { %p815_p7 = pnand %p813_p6, %p810_p5 }
 0x338   :  { %818 = shalt.err (!%p815_p7)
}
 0x339   :  { %s841_s22 = smov 128   ;;  %s842_s23 = smov 8  }
 0x33a   :  { %480 = dma.vmem_to_hbm [thread:$0]  %s475_s3, 256, %s1042_s7, [#allocation4], %s841_s22, %s841_s22, %s842_s23  }
 0x33b   :  { %827 = dma.done.wait [#allocation4], 256  }
 0x33c   :  { %828 = vsyncadd [#allocation4], 4294967040 }
 0x33d   :  { %484 = vsyncpa [#allocation3], 1 }
 0x33e   :  { %485 = vsyncpa [#allocation6], 1 }
 0x33f   :  { %486 = vsyncpa [#allocation9], 1 }
 0x340   :  { %487 = vsyncpa [#allocation12], 1 }
 0x341   :  { %488 = vsyncpa [#allocation4], 1 }

</bundles_post_ra>
